<compile_context>
chip_gen: v6e
topology: v6e:2x2x1
jax: 0.10.0
libtpu: 0.0.40
codegen_flags: <defaults>
</compile_context>

<pallas_src>
import functools

import jax
import jax.numpy as jnp
from jax.experimental import pallas as pl
from jax.experimental.pallas import tpu as pltpu

PAD_DIM = 128  # lane-dense feature slab


def _fused_gat_kernel(x_ref, adjb_ref, w_ref, b_ref, o_ref, *, feat_dims):
    # x:    (N, 128)      f32 node features, zero-padded beyond the real feature dim
    # adjb: (N, N)        bf16 additive mask: 0 where edge src->dst exists, -1e30 otherwise
    # w:    (3, 128, 128) bf16 augmented weights: [:, :, :F]=W, [:, :, F]=W@a_l^T, [:, :, F+1]=W@a_r^T
    # b:    (3, 1, 128)   f32 biases, zero-padded
    # o:    (N, 128)      final node features (first out_size columns are valid)
    adj_bias = adjb_ref[...]                                     # keep in bf16; promote on add

    h = x_ref[...]                                               # (N, 128) f32
    for li, f in enumerate(feat_dims):
        # Single bf16 MXU matmul yields projected features AND both attention scores.
        z = jnp.dot(h.astype(jnp.bfloat16), w_ref[li],
                    preferred_element_type=jnp.float32)          # (N, 128) f32

        el = z[:, f:f + 1]                                       # (N, 1) source score
        er = z[:, f + 1:f + 2]                                   # (N, 1) destination score

        # e[dst, src] = leaky_relu(er[dst] + el[src]) + mask_bias
        e = er + jnp.transpose(el, (1, 0))                       # (N_dst, N_src)
        e = jnp.where(e > 0, e, 0.2 * e)                         # LeakyReLU, slope 0.2
        e = e + adj_bias                                         # bf16 -> f32 promote; -1e30 on non-edges

        # Edge softmax over incoming edges (src axis), f32; masked entries underflow to 0.
        m = jnp.max(e, axis=-1, keepdims=True)
        p = jnp.exp(e - m)                                       # (N, N)
        denom = jnp.maximum(jnp.sum(p, axis=-1, keepdims=True), 1e-30)
        alpha = p * pl.reciprocal(denom, approx=True)            # (N, N) f32

        # Aggregate with bf16 MXU matmul. Columns f, f+1 carry alpha@el / alpha@er junk;
        # they are killed by the next layer's zero-padded W rows / trimmed at the end.
        out = jnp.dot(alpha.astype(jnp.bfloat16), z.astype(jnp.bfloat16),
                      preferred_element_type=jnp.float32)        # (N, 128) f32
        out = out + b_ref[li]                                    # (1, 128) broadcast

        if li != 2:  # first two layers: ELU activation; last layer: none
            out = jnp.where(out > 0, out, jnp.exp(jnp.minimum(out, 0.0)) - 1.0)

        h = out

    o_ref[...] = h


def build_packed_params(params):
    """One-time (host/setup-side) packing of per-layer (W, a_l, a_r, b) into slabs."""
    ws, bs, fs = [], [], []
    for (w, al, ar, b) in params:
        din, f = w.shape
        w_aug = jnp.zeros((PAD_DIM, PAD_DIM), jnp.float32)
        w_aug = w_aug.at[:din, :f].set(w)
        w_aug = w_aug.at[:din, f].set((w @ al.T)[:, 0])          # el column
        w_aug = w_aug.at[:din, f + 1].set((w @ ar.T)[:, 0])      # er column
        ws.append(w_aug)
        bs.append(jnp.zeros((1, PAD_DIM), jnp.float32).at[:, :f].set(b))
        fs.append(f)
    w_packed = jnp.stack(ws).astype(jnp.bfloat16)                # (3, 128, 128) bf16
    b_packed = jnp.stack(bs)                                     # (3, 1, 128)   f32
    return w_packed, b_packed, tuple(fs)


def build_adj_bias(adj):
    """One-time pre-biased additive mask in bf16 (halves adjacency DMA/VMEM bytes)."""
    return jnp.where(adj > 0, 0.0, -1e30).astype(jnp.bfloat16)


@functools.partial(jax.jit, static_argnames=("feat_dims", "in_size", "out_size"))
def gnn_forward(adj_bias, inputs, w_packed, b_packed, *, feat_dims, in_size, out_size):
    """Pallas equivalent of dgl_GNNModel.forward (heads=[1,1], eval mode)."""
    n = inputs.shape[0]
    x_pad = jnp.zeros((n, PAD_DIM), jnp.float32).at[:, :in_size].set(inputs)

    kernel = functools.partial(_fused_gat_kernel, feat_dims=feat_dims)
    vmem = pl.BlockSpec(memory_space=pltpu.MemorySpace.VMEM)

    # Advisory cost estimate (3 layers: projection + aggregation matmuls + softmax).
    flops = 0
    for _ in feat_dims:
        flops += 2 * n * PAD_DIM * PAD_DIM + 2 * n * n * PAD_DIM + 8 * n * n
    in_bytes = (x_pad.size * 4 + adj_bias.size * 2
                + w_packed.size * 2 + b_packed.size * 4)
    out_bytes = n * PAD_DIM * 4
    cost = pl.CostEstimate(flops=int(flops),
                           transcendentals=int(3 * n * n + 2 * n * PAD_DIM),
                           bytes_accessed=int(in_bytes + out_bytes))

    # Scoped VMEM sized from the (N,N) buffers (mask + e/p/alpha intermediates),
    # clamped to stay portable to v7x's 64 MiB physical VMEM.
    vmem_bytes = 2 * (in_bytes + out_bytes) + 8 * n * n * 4 + (2 << 20)
    vmem_limit = int(min(max(vmem_bytes, 16 << 20), 60 << 20))

    out_pad = pl.pallas_call(
        kernel,
        out_shape=jax.ShapeDtypeStruct((n, PAD_DIM), jnp.float32),
        in_specs=[vmem] * 4,
        out_specs=vmem,
        compiler_params=pltpu.CompilerParams(vmem_limit_bytes=vmem_limit),
        cost_estimate=cost,
    )(x_pad, adj_bias, w_packed, b_packed)

    return out_pad[:, :out_size]


def init_params(key, in_size, hid_size, out_size):
    """Deterministic param init mirroring the three GATConv layers (heads=[1,1])."""
    dims = [(in_size, hid_size), (hid_size, hid_size), (hid_size, out_size)]
    params = []
    for (din, dout) in dims:
        key, k_w, k_al, k_ar = jax.random.split(key, 4)
        scale = 1.0 / jnp.sqrt(jnp.float32(din))
        w = jax.random.normal(k_w, (din, dout), jnp.float32) * scale
        al = jax.random.normal(k_al, (1, dout), jnp.float32) * 0.1
        ar = jax.random.normal(k_ar, (1, dout), jnp.float32) * 0.1
        b = jnp.zeros((1, dout), jnp.float32)
        params.append((w, al, ar, b))
    return params


if __name__ == "__main__":
    N = 32            # number of graph nodes
    IN_SIZE = 16
    HID_SIZE = 16
    OUT_SIZE = 8

    key = jax.random.PRNGKey(0)
    k_feat, k_param = jax.random.split(key)

    # Node features
    x = jax.random.normal(k_feat, (N, IN_SIZE), jnp.float32)

    # Small deterministic graph: ring edges (i-1 -> i, i+1 -> i) plus self-loops.
    idx = jnp.arange(N)
    adj = jnp.zeros((N, N), jnp.float32)
    adj = adj.at[idx, idx].set(1.0)                       # self-loops
    adj = adj.at[idx, (idx - 1) % N].set(1.0)             # src = i-1 -> dst = i
    adj = adj.at[idx, (idx + 1) % N].set(1.0)             # src = i+1 -> dst = i

    params = init_params(k_param, IN_SIZE, HID_SIZE, OUT_SIZE)

    # One-time setup (hoisted out of the per-forward path).
    w_packed, b_packed, feat_dims = build_packed_params(params)
    adj_bias = build_adj_bias(adj)
    w_packed, b_packed, adj_bias = jax.block_until_ready(
        (w_packed, b_packed, adj_bias))

    out = gnn_forward(adj_bias, x, w_packed, b_packed,
                      feat_dims=feat_dims, in_size=IN_SIZE, out_size=OUT_SIZE)
    out = jax.block_until_ready(out)
    assert out.shape == (N, OUT_SIZE), out.shape
    assert jnp.all(jnp.isfinite(out))
    print("KERNEL_OK")
</pallas_src>

<mosaic_0001>
module attributes {stable_mosaic.version = 11 : i64} {
  func.func @_fused_gat_kernel(%arg0: memref<32x128xf32, #tpu.memory_space<vmem>>, %arg1: memref<32x32xbf16, #tpu.memory_space<vmem>>, %arg2: memref<3x128x128xbf16, #tpu.memory_space<vmem>>, %arg3: memref<3x1x128xf32, #tpu.memory_space<vmem>>, %arg4: memref<32x128xf32, #tpu.memory_space<vmem>>) attributes {dimension_semantics = [], scalar_prefetch = 0 : i64, scratch_operands = 0 : i64, tpu.core_type = #tpu.core_type<tc>} {
    %c0 = arith.constant 0 : index
    %c0_0 = arith.constant 0 : index
    %0 = vector.load %arg1[%c0, %c0_0] : memref<32x32xbf16, #tpu.memory_space<vmem>>, vector<32x32xbf16>
    %c0_1 = arith.constant 0 : index
    %c0_2 = arith.constant 0 : index
    %1 = vector.load %arg0[%c0_1, %c0_2] : memref<32x128xf32, #tpu.memory_space<vmem>>, vector<32x128xf32>
    %2 = arith.truncf %1 : vector<32x128xf32> to vector<32x128xbf16>
    %c0_3 = arith.constant 0 : index
    %c0_4 = arith.constant 0 : index
    %c0_5 = arith.constant 0 : index
    %3 = vector.load %arg2[%c0_3, %c0_4, %c0_5] : memref<3x128x128xbf16, #tpu.memory_space<vmem>>, vector<1x128x128xbf16>
    %4 = vector.shape_cast %3 : vector<1x128x128xbf16> to vector<128x128xbf16>
    %cst = arith.constant dense<0.000000e+00> : vector<32x128xf32>
    %5 = tpu.matmul %2, %4, %cst {dimension_numbers = #tpu.dot_dimension_numbers<[1], [0], [0], [1], [0, 0, 1, 1], [], []>} : vector<32x128xbf16>, vector<128x128xbf16>, vector<32x128xf32> -> vector<32x128xf32>
    %6 = vector.extract_strided_slice %5 {offsets = [0, 16], sizes = [32, 1], strides = [1, 1]} : vector<32x128xf32> to vector<32x1xf32>
    %7 = vector.extract_strided_slice %5 {offsets = [0, 17], sizes = [32, 1], strides = [1, 1]} : vector<32x128xf32> to vector<32x1xf32>
    %8 = tpu.transpose %6, [1, 0] : vector<32x1xf32> -> vector<1x32xf32>
    %9 = vector.broadcast %7 : vector<32x1xf32> to vector<32x32xf32>
    %10 = vector.broadcast %8 : vector<1x32xf32> to vector<32x32xf32>
    %11 = arith.addf %9, %10 : vector<32x32xf32>
    %cst_6 = arith.constant 0.000000e+00 : f32
    %12 = vector.broadcast %cst_6 : f32 to vector<32x32xf32>
    %13 = arith.cmpf ogt, %11, %12 : vector<32x32xf32>
    %cst_7 = arith.constant 2.000000e-01 : f32
    %14 = vector.broadcast %cst_7 : f32 to vector<32x32xf32>
    %15 = arith.mulf %14, %11 : vector<32x32xf32>
    %16 = arith.select %13, %11, %15 : vector<32x32xi1>, vector<32x32xf32>
    %17 = arith.extf %0 : vector<32x32xbf16> to vector<32x32xf32>
    %18 = arith.addf %16, %17 : vector<32x32xf32>
    %cst_8 = arith.constant dense<0xFF800000> : vector<32xf32>
    %19 = vector.multi_reduction <maximumf>, %18, %cst_8 [1] : vector<32x32xf32> to vector<32xf32>
    %20 = vector.shape_cast %19 : vector<32xf32> to vector<32x1xf32>
    %21 = vector.broadcast %20 : vector<32x1xf32> to vector<32x32xf32>
    %22 = arith.subf %18, %21 : vector<32x32xf32>
    %23 = math.exp %22 : vector<32x32xf32>
    %cst_9 = arith.constant dense<0.000000e+00> : vector<32xf32>
    %24 = vector.multi_reduction <add>, %23, %cst_9 [1] : vector<32x32xf32> to vector<32xf32>
    %25 = vector.shape_cast %24 : vector<32xf32> to vector<32x1xf32>
    %cst_10 = arith.constant 1.000000e-30 : f32
    %26 = vector.broadcast %cst_10 : f32 to vector<32x1xf32>
    %27 = arith.maximumf %25, %26 : vector<32x1xf32>
    %28 = tpu.reciprocal %27 {approx = true} : vector<32x1xf32> -> vector<32x1xf32>
    %29 = vector.broadcast %28 : vector<32x1xf32> to vector<32x32xf32>
    %30 = arith.mulf %23, %29 : vector<32x32xf32>
    %31 = arith.truncf %30 : vector<32x32xf32> to vector<32x32xbf16>
    %32 = arith.truncf %5 : vector<32x128xf32> to vector<32x128xbf16>
    %cst_11 = arith.constant dense<0.000000e+00> : vector<32x128xf32>
    %33 = tpu.matmul %31, %32, %cst_11 {dimension_numbers = #tpu.dot_dimension_numbers<[1], [0], [0], [1], [0, 0, 1, 1], [], []>} : vector<32x32xbf16>, vector<32x128xbf16>, vector<32x128xf32> -> vector<32x128xf32>
    %c0_12 = arith.constant 0 : index
    %c0_13 = arith.constant 0 : index
    %c0_14 = arith.constant 0 : index
    %34 = vector.load %arg3[%c0_12, %c0_13, %c0_14] : memref<3x1x128xf32, #tpu.memory_space<vmem>>, vector<1x1x128xf32>
    %35 = vector.shape_cast %34 : vector<1x1x128xf32> to vector<1x128xf32>
    %36 = vector.broadcast %35 : vector<1x128xf32> to vector<32x128xf32>
    %37 = arith.addf %33, %36 : vector<32x128xf32>
    %cst_15 = arith.constant 0.000000e+00 : f32
    %38 = vector.broadcast %cst_15 : f32 to vector<32x128xf32>
    %39 = arith.cmpf ogt, %37, %38 : vector<32x128xf32>
    %cst_16 = arith.constant 0.000000e+00 : f32
    %40 = vector.broadcast %cst_16 : f32 to vector<32x128xf32>
    %41 = arith.minimumf %37, %40 : vector<32x128xf32>
    %42 = math.exp %41 : vector<32x128xf32>
    %cst_17 = arith.constant 1.000000e+00 : f32
    %43 = vector.broadcast %cst_17 : f32 to vector<32x128xf32>
    %44 = arith.subf %42, %43 : vector<32x128xf32>
    %45 = arith.select %39, %37, %44 : vector<32x128xi1>, vector<32x128xf32>
    %46 = arith.truncf %45 : vector<32x128xf32> to vector<32x128xbf16>
    %c1 = arith.constant 1 : index
    %c0_18 = arith.constant 0 : index
    %c0_19 = arith.constant 0 : index
    %47 = vector.load %arg2[%c1, %c0_18, %c0_19] : memref<3x128x128xbf16, #tpu.memory_space<vmem>>, vector<1x128x128xbf16>
    %48 = vector.shape_cast %47 : vector<1x128x128xbf16> to vector<128x128xbf16>
    %cst_20 = arith.constant dense<0.000000e+00> : vector<32x128xf32>
    %49 = tpu.matmul %46, %48, %cst_20 {dimension_numbers = #tpu.dot_dimension_numbers<[1], [0], [0], [1], [0, 0, 1, 1], [], []>} : vector<32x128xbf16>, vector<128x128xbf16>, vector<32x128xf32> -> vector<32x128xf32>
    %50 = vector.extract_strided_slice %49 {offsets = [0, 16], sizes = [32, 1], strides = [1, 1]} : vector<32x128xf32> to vector<32x1xf32>
    %51 = vector.extract_strided_slice %49 {offsets = [0, 17], sizes = [32, 1], strides = [1, 1]} : vector<32x128xf32> to vector<32x1xf32>
    %52 = tpu.transpose %50, [1, 0] : vector<32x1xf32> -> vector<1x32xf32>
    %53 = vector.broadcast %51 : vector<32x1xf32> to vector<32x32xf32>
    %54 = vector.broadcast %52 : vector<1x32xf32> to vector<32x32xf32>
    %55 = arith.addf %53, %54 : vector<32x32xf32>
    %cst_21 = arith.constant 0.000000e+00 : f32
    %56 = vector.broadcast %cst_21 : f32 to vector<32x32xf32>
    %57 = arith.cmpf ogt, %55, %56 : vector<32x32xf32>
    %cst_22 = arith.constant 2.000000e-01 : f32
    %58 = vector.broadcast %cst_22 : f32 to vector<32x32xf32>
    %59 = arith.mulf %58, %55 : vector<32x32xf32>
    %60 = arith.select %57, %55, %59 : vector<32x32xi1>, vector<32x32xf32>
    %61 = arith.extf %0 : vector<32x32xbf16> to vector<32x32xf32>
    %62 = arith.addf %60, %61 : vector<32x32xf32>
    %cst_23 = arith.constant dense<0xFF800000> : vector<32xf32>
    %63 = vector.multi_reduction <maximumf>, %62, %cst_23 [1] : vector<32x32xf32> to vector<32xf32>
    %64 = vector.shape_cast %63 : vector<32xf32> to vector<32x1xf32>
    %65 = vector.broadcast %64 : vector<32x1xf32> to vector<32x32xf32>
    %66 = arith.subf %62, %65 : vector<32x32xf32>
    %67 = math.exp %66 : vector<32x32xf32>
    %cst_24 = arith.constant dense<0.000000e+00> : vector<32xf32>
    %68 = vector.multi_reduction <add>, %67, %cst_24 [1] : vector<32x32xf32> to vector<32xf32>
    %69 = vector.shape_cast %68 : vector<32xf32> to vector<32x1xf32>
    %cst_25 = arith.constant 1.000000e-30 : f32
    %70 = vector.broadcast %cst_25 : f32 to vector<32x1xf32>
    %71 = arith.maximumf %69, %70 : vector<32x1xf32>
    %72 = tpu.reciprocal %71 {approx = true} : vector<32x1xf32> -> vector<32x1xf32>
    %73 = vector.broadcast %72 : vector<32x1xf32> to vector<32x32xf32>
    %74 = arith.mulf %67, %73 : vector<32x32xf32>
    %75 = arith.truncf %74 : vector<32x32xf32> to vector<32x32xbf16>
    %76 = arith.truncf %49 : vector<32x128xf32> to vector<32x128xbf16>
    %cst_26 = arith.constant dense<0.000000e+00> : vector<32x128xf32>
    %77 = tpu.matmul %75, %76, %cst_26 {dimension_numbers = #tpu.dot_dimension_numbers<[1], [0], [0], [1], [0, 0, 1, 1], [], []>} : vector<32x32xbf16>, vector<32x128xbf16>, vector<32x128xf32> -> vector<32x128xf32>
    %c1_27 = arith.constant 1 : index
    %c0_28 = arith.constant 0 : index
    %c0_29 = arith.constant 0 : index
    %78 = vector.load %arg3[%c1_27, %c0_28, %c0_29] : memref<3x1x128xf32, #tpu.memory_space<vmem>>, vector<1x1x128xf32>
    %79 = vector.shape_cast %78 : vector<1x1x128xf32> to vector<1x128xf32>
    %80 = vector.broadcast %79 : vector<1x128xf32> to vector<32x128xf32>
    %81 = arith.addf %77, %80 : vector<32x128xf32>
    %cst_30 = arith.constant 0.000000e+00 : f32
    %82 = vector.broadcast %cst_30 : f32 to vector<32x128xf32>
    %83 = arith.cmpf ogt, %81, %82 : vector<32x128xf32>
    %cst_31 = arith.constant 0.000000e+00 : f32
    %84 = vector.broadcast %cst_31 : f32 to vector<32x128xf32>
    %85 = arith.minimumf %81, %84 : vector<32x128xf32>
    %86 = math.exp %85 : vector<32x128xf32>
    %cst_32 = arith.constant 1.000000e+00 : f32
    %87 = vector.broadcast %cst_32 : f32 to vector<32x128xf32>
    %88 = arith.subf %86, %87 : vector<32x128xf32>
    %89 = arith.select %83, %81, %88 : vector<32x128xi1>, vector<32x128xf32>
    %90 = arith.truncf %89 : vector<32x128xf32> to vector<32x128xbf16>
    %c2 = arith.constant 2 : index
    %c0_33 = arith.constant 0 : index
    %c0_34 = arith.constant 0 : index
    %91 = vector.load %arg2[%c2, %c0_33, %c0_34] : memref<3x128x128xbf16, #tpu.memory_space<vmem>>, vector<1x128x128xbf16>
    %92 = vector.shape_cast %91 : vector<1x128x128xbf16> to vector<128x128xbf16>
    %cst_35 = arith.constant dense<0.000000e+00> : vector<32x128xf32>
    %93 = tpu.matmul %90, %92, %cst_35 {dimension_numbers = #tpu.dot_dimension_numbers<[1], [0], [0], [1], [0, 0, 1, 1], [], []>} : vector<32x128xbf16>, vector<128x128xbf16>, vector<32x128xf32> -> vector<32x128xf32>
    %94 = vector.extract_strided_slice %93 {offsets = [0, 8], sizes = [32, 1], strides = [1, 1]} : vector<32x128xf32> to vector<32x1xf32>
    %95 = vector.extract_strided_slice %93 {offsets = [0, 9], sizes = [32, 1], strides = [1, 1]} : vector<32x128xf32> to vector<32x1xf32>
    %96 = tpu.transpose %94, [1, 0] : vector<32x1xf32> -> vector<1x32xf32>
    %97 = vector.broadcast %95 : vector<32x1xf32> to vector<32x32xf32>
    %98 = vector.broadcast %96 : vector<1x32xf32> to vector<32x32xf32>
    %99 = arith.addf %97, %98 : vector<32x32xf32>
    %cst_36 = arith.constant 0.000000e+00 : f32
    %100 = vector.broadcast %cst_36 : f32 to vector<32x32xf32>
    %101 = arith.cmpf ogt, %99, %100 : vector<32x32xf32>
    %cst_37 = arith.constant 2.000000e-01 : f32
    %102 = vector.broadcast %cst_37 : f32 to vector<32x32xf32>
    %103 = arith.mulf %102, %99 : vector<32x32xf32>
    %104 = arith.select %101, %99, %103 : vector<32x32xi1>, vector<32x32xf32>
    %105 = arith.extf %0 : vector<32x32xbf16> to vector<32x32xf32>
    %106 = arith.addf %104, %105 : vector<32x32xf32>
    %cst_38 = arith.constant dense<0xFF800000> : vector<32xf32>
    %107 = vector.multi_reduction <maximumf>, %106, %cst_38 [1] : vector<32x32xf32> to vector<32xf32>
    %108 = vector.shape_cast %107 : vector<32xf32> to vector<32x1xf32>
    %109 = vector.broadcast %108 : vector<32x1xf32> to vector<32x32xf32>
    %110 = arith.subf %106, %109 : vector<32x32xf32>
    %111 = math.exp %110 : vector<32x32xf32>
    %cst_39 = arith.constant dense<0.000000e+00> : vector<32xf32>
    %112 = vector.multi_reduction <add>, %111, %cst_39 [1] : vector<32x32xf32> to vector<32xf32>
    %113 = vector.shape_cast %112 : vector<32xf32> to vector<32x1xf32>
    %cst_40 = arith.constant 1.000000e-30 : f32
    %114 = vector.broadcast %cst_40 : f32 to vector<32x1xf32>
    %115 = arith.maximumf %113, %114 : vector<32x1xf32>
    %116 = tpu.reciprocal %115 {approx = true} : vector<32x1xf32> -> vector<32x1xf32>
    %117 = vector.broadcast %116 : vector<32x1xf32> to vector<32x32xf32>
    %118 = arith.mulf %111, %117 : vector<32x32xf32>
    %119 = arith.truncf %118 : vector<32x32xf32> to vector<32x32xbf16>
    %120 = arith.truncf %93 : vector<32x128xf32> to vector<32x128xbf16>
    %cst_41 = arith.constant dense<0.000000e+00> : vector<32x128xf32>
    %121 = tpu.matmul %119, %120, %cst_41 {dimension_numbers = #tpu.dot_dimension_numbers<[1], [0], [0], [1], [0, 0, 1, 1], [], []>} : vector<32x32xbf16>, vector<32x128xbf16>, vector<32x128xf32> -> vector<32x128xf32>
    %c2_42 = arith.constant 2 : index
    %c0_43 = arith.constant 0 : index
    %c0_44 = arith.constant 0 : index
    %122 = vector.load %arg3[%c2_42, %c0_43, %c0_44] : memref<3x1x128xf32, #tpu.memory_space<vmem>>, vector<1x1x128xf32>
    %123 = vector.shape_cast %122 : vector<1x1x128xf32> to vector<1x128xf32>
    %124 = vector.broadcast %123 : vector<1x128xf32> to vector<32x128xf32>
    %125 = arith.addf %121, %124 : vector<32x128xf32>
    %c0_45 = arith.constant 0 : index
    %c0_46 = arith.constant 0 : index
    %126 = vector.load %arg4[%c0_45, %c0_46] : memref<32x128xf32, #tpu.memory_space<vmem>>, vector<32x128xf32>
    tpu.vector_store %arg4[%c0_45, %c0_46], %125 {strides = array<i32>} : memref<32x128xf32, #tpu.memory_space<vmem>>, vector<32x128xf32>,
    return
  }
}

</mosaic_0001>

<bundles_post_ra>
// kernel: gnn_forward.1
= control target key start
LH: loop header
LB: loop body
LE: loop exit
PB: predicated region body
PF: predicated region fallthrough
CT: control target
= control target key end

     0   :  { %9 = vsyncpa [#allocation3], 0  ;;  %s1357_s15 = smov [#allocation2]   ;;  %s1494_s0 = inlined_call_operand.vmem [shape: f32[32,128], index: 0, kind: input, shape index: {}]   ;;  %s1495_s1 = inlined_call_operand.vmem [shape: bf16[32,32], index: 1, kind: input, shape index: {}]   ;;  %s1496_s2 = inlined_call_operand.hbm [shape: bf16[3,128,128], index: 2, kind: input, shape index: {}]   ;;  %s1497_s3 = inlined_call_operand.vmem [shape: f32[3,1,128], index: 3, kind: input, shape index: {}]   ;;  %s1498_s4 = inlined_call_operand.vmem [shape: f32[32,128], index: 4, kind: output, shape index: {}]  }
   0x1   :  { %s19_s16 = sshll.u32 %s1357_s15, 4  ;;  %s20_s16 = int_to_ptr.vmem [resolvable:$true] %s19_s16 }
   0x2   :  { %s1343_s17 = scalar_lea.vmem %s20_s16, 3072  ;;  %p1348_p1 = scmp.lt.s32.totalorder %s20_s16, %s20_s16 }
   0x3   :  { %p1344_p0 = scmp.ne.s32.totalorder %s20_s16, %s1343_s17  ;;  %p1349_p2 = scmp.lt.s32.totalorder %s1343_s17, %s1343_s17 }
   0x5   :  { %p1350_p3 = por %p1349_p2, %p1348_p1 }
   0x7   :  { %p1351_p4 = pnand %p1350_p3, %p1344_p0 }
   0x9   :  { %1354 = shalt.err (!%p1351_p4)
}
   0xa   :  { %s1358_s18 = smov 64   ;;  %s1359_s19 = smov 4  }
   0xb   :  { %25 = dma.hbm_to_vmem [thread:$0]  %s1496_s2, 3072, %s20_s16, [#allocation3], %s1358_s18, %s1358_s18, %s1359_s19  }
   0xc   :  { %1355 = dma.done.wait [#allocation3], 3072  }
   0xd   :  { %1356 = vsyncadd [#allocation3], 4294964224  ;;  %v1247_v0 = vld [vmem:[#allocation2 + $0x38] sm:$0xff]   ;;  %v1248_v1 = vld [vmem:[#allocation2 + $0x30] sm:$0xff]   ;;  %v1360_v14 = vmov 17   ;;  %s1361_s29 = smov 112   ;;  %v219_v25 = vlaneseq }
   0xe   :  { %1151 = vmatprep.subr.bf16.mxu0 %v1247_v0  ;;  %v1249_v2 = vld [vmem:[#allocation2 + $0x28] sm:$0xff]   ;;  %v1250_v3 = vld [vmem:[#allocation2 + $0x20] sm:$0xff]   ;;  %v1251_v7 = vld [vmem:[#allocation2 + $0x18] sm:$0xff]   ;;  %1244 = vset.pattern.permute.xlu1 %v1360_v14  ;;  %vm247_vm2 = vcmask 261120   ;;  %s1363_s10 = smov 120  }
   0xf   :  { %1152 = vmatpush3.bf16.msra.mxu0 %v1247_v0  ;;  %v36_v4 = vld [vmem:[%s1494_s0] sm:$0xff]  ;;  %v37_v5 = vld [vmem:[%s1494_s0 + $0x8] sm:$0xff]  ;;  %v1252_v8 = vld [vmem:[#allocation2 + $0x10] sm:$0xff]   ;;  %1243 = vset.pattern.permute.xlu0 %v1360_v14  ;;  %v220_v27 = vshrl.u32 %v219_v25, 7 }
  0x10   :  { %1153 = vmatprep.subr.bf16.mxu0 %v1248_v1  ;;  %v40_v6 = vpack.c.bf16 %v37_v5, %v36_v4  ;;  %v1253_v9 = vld [vmem:[#allocation2 + $0x8] sm:$0xff]   ;;  %v1254_v10 = vld [vmem:[#allocation2] sm:$0xff]   ;;  %v38_v11 = vld [vmem:[%s1494_s0 + $0x10] sm:$0xff] }
  0x11   :  { %v39_v12 = vld [vmem:[%s1494_s0 + $0x18] sm:$0xff]  ;;  %v1408_v29 = vsub.s32 0, %v220_v27  ;;  %v1101_v33 = vld [vmem:[%s1495_s1] sm:$0xff]   ;;  %v1108_v44 = vld [vmem:[%s1495_s1 + $0x8] sm:$0xff]  }
  0x12   :  { %1167 = vmatprep.mubr.bf16.mxu0 %v40_v6  ;;  %v41_v13 = vpack.c.bf16 %v39_v12, %v38_v11  ;;  %v1414_v37 = vunpack.c.l.bf16 %v1101_v33  ;;  %v1416_v41 = vunpack.c.h.bf16 %v1101_v33  ;;  %v1424_v50 = vunpack.c.l.bf16 %v1108_v44 }
  0x13   :  { %1154 = vmatpush3.bf16.msra.mxu0 %v1248_v1  ;;  %v1428_v55 = vunpack.c.h.bf16 %v1108_v44  ;;  %v1262_v44 = vld [vmem:[#allocation2 + $0x40] sm:$0xff]  }
  0x14   :  { %1155 = vmatprep.subr.bf16.mxu0 %v1249_v2 }
  0x17   :  { %1156 = vmatpush3.bf16.msra.mxu0 %v1249_v2 }
  0x18   :  { %1157 = vmatprep.subr.bf16.mxu0 %v1250_v3 }
  0x1b   :  { %1158 = vmatpush3.bf16.msra.mxu0 %v1250_v3 }
  0x1c   :  { %1159 = vmatprep.subr.bf16.mxu0 %v1251_v7 }
  0x1f   :  { %1160 = vmatpush3.bf16.msra.mxu0 %v1251_v7 }
  0x20   :  { %1161 = vmatprep.subr.bf16.mxu0 %v1252_v8 }
  0x23   :  { %1162 = vmatpush3.bf16.msra.mxu0 %v1252_v8 }
  0x24   :  { %1163 = vmatprep.subr.bf16.mxu0 %v1253_v9 }
  0x27   :  { %1164 = vmatpush3.bf16.msra.mxu0 %v1253_v9 }
  0x28   :  { %1165 = vmatprep.subr.bf16.mxu0 %v1254_v10 }
  0x2b   :  { %1166 = vmatpush3.bf16.msra.mxu0 %v1254_v10 }
  0x2e   :  { %1168 = vmatmul.mubr.bf16.vlgmr.msra.gmra.mxu0 %v41_v13 }
  0xee   :  { %v1169_v15 = vpop.f32.mrf.mxu0 }
  0xef   :  { %163 = vrot.lane.b32.xlu1 %v1169_v15, %s1361_s29 }
  0xf0   :  { %v140_v16 = vpop.f32.mrf.mxu0 }
  0xf1   :  { %159 = vrot.lane.b32.xlu0 %v140_v16, %s1361_s29 }
  0xf2   :  { %v1170_v17 = vpop.f32.mrf.mxu0 }
  0xf3   :  { %165 = vrot.lane.b32.xlu1 %v1170_v17, %s1361_s29  ;;  %v299_v18 = vpack.c.bf16 %v1170_v17, %v1169_v15 }
  0xf4   :  { %v143_v19 = vpop.f32.mrf.mxu0 }
  0xf5   :  { %v298_v20 = vpack.c.bf16 %v143_v19, %v140_v16  ;;  %1171 = vmatprep.subr.bf16.mxu1 %v299_v18  ;;  %161 = vrot.lane.b32.xlu0 %v143_v19, %s1361_s29 }
  0xf6   :  { %1172 = vmatpush3.bf16.msra.mxu1 %v299_v18 }
  0xf7   :  { %212 = vperm.xlu1 %1244, %v1169_v15   ;;  %1173 = vmatprep.subr.bf16.mxu1 %v298_v20 }
  0xf9   :  { %204 = vperm.xlu0 %1243, %v140_v16  }
  0xfa   :  { %1174 = vmatpush3.bf16.msra.mxu1 %v298_v20 }
  0xfb   :  { %208 = vperm.xlu1 %1244, %v143_v19  }
  0xfd   :  { %216 = vperm.xlu0 %1243, %v1170_v17  }
 0x161   :  { %v164_v23 = vpop.permute.xlu1 %163 }
 0x163   :  { %v160_v21 = vpop.permute.xlu0 %159 }
 0x164   :  { %171 = vxpose.xlu1.b32.start [1/4] (short) (narrow) %v160_v21, 8 }
 0x165   :  { %v166_v24 = vpop.permute.xlu1 %165 }
 0x167   :  { %v162_v22 = vpop.permute.xlu0 %161 }
 0x168   :  { %172 = vxpose.xlu1.b32.cont [2/4] (short) (narrow) %v162_v22, 8 }
 0x16c   :  { %173 = vxpose.xlu1.b32.cont [3/4] (short) (narrow) %v164_v23, 8 }
 0x170   :  { %174 = vxpose.xlu1.b32.end [4/4] (short) (narrow) %v166_v24, 8 }
 0x172   :  { %v213_v26 = vpop.permute.xlu1 %212 }
 0x174   :  { %v205_v30 = vpop.permute.xlu0 %204 }
 0x176   :  { %v209_v28 = vpop.permute.xlu1 %208 }
 0x178   :  { %v217_v40 = vpop.permute.xlu0 %216 }
 0x1e0   :  { %v187_v31 = vpop.trf.xlu1 }
 0x1e1   :  { %v222_v32 = vrot.slane %v187_v31, %v1408_v29 }
 0x1e3   :  { %v223_v34 = vadd.f32 %v222_v32, %v205_v30  ;;  %v224_v35 = vadd.f32 %v222_v32, %v209_v28  ;;  %v225_v36 = vadd.f32 %v222_v32, %v213_v26  ;;  %v226_v46 = vadd.f32 %v222_v32, %v217_v40  ;;  %v1259_v40 = vld [vmem:[#allocation2 + $0x58] sm:$0xff]  }
 0x1e5   :  { %vm227_vm0 = vcmp.gt.f32.partialorder %v223_v34, 0.0  ;;  %v231_v38 = vmul.f32 0.2, %v223_v34  ;;  %vm228_vm1 = vcmp.gt.f32.partialorder %v224_v35, 0.0  ;;  %v232_v39 = vmul.f32 0.2, %v224_v35 }
 0x1e6   :  { %v233_v45 = vmul.f32 0.2, %v225_v36  ;;  %vm229_vm3 = vcmp.gt.f32.partialorder %v225_v36, 0.0  ;;  %v234_v52 = vmul.f32 0.2, %v226_v46  ;;  %vm230_vm4 = vcmp.gt.f32.partialorder %v226_v46, 0.0 }
 0x1e7   :  { %v235_v42 = vsel %vm227_vm0, %v223_v34, %v231_v38  ;;  %v236_v43 = vsel %vm228_vm1, %v224_v35, %v232_v39  ;;  %v1255_v35 = vld [vmem:[#allocation2 + $0x78] sm:$0xff]   ;;  %v1257_v38 = vld [vmem:[#allocation2 + $0x68] sm:$0xff]   ;;  %v1258_v39 = vld [vmem:[#allocation2 + $0x60] sm:$0xff]  }
 0x1e8   :  { %v243_v47 = vadd.f32 %v1414_v37, %v235_v42  ;;  %v244_v49 = vadd.f32 %v1416_v41, %v236_v43  ;;  %v237_v51 = vsel %vm229_vm3, %v225_v36, %v233_v45  ;;  %v238_v56 = vsel %vm230_vm4, %v226_v46, %v234_v52  ;;  %1179 = vmatprep.subr.bf16.mxu1 %v1255_v35  ;;  %v1256_v36 = vld [vmem:[#allocation2 + $0x70] sm:$0xff]   ;;  %v1261_v43 = vld [vmem:[#allocation2 + $0x48] sm:$0xff]   ;;  %v1065_v45 = vld [vmem:[%s1497_s3] ss:$0 sm:$0xff] }
 0x1e9   :  { %v245_v54 = vadd.f32 %v1424_v50, %v237_v51  ;;  %v246_v58 = vadd.f32 %v1428_v55, %v238_v56  ;;  %v1260_v42 = vld [vmem:[#allocation2 + $0x50] sm:$0xff]  }
 0x1ea   :  { %v248_v48 = vsel %vm247_vm2, %v243_v47, -inf  ;;  %v251_v53 = vsel %vm247_vm2, %v244_v49, -inf }
 0x1eb   :  { %249 = vmax.xlane.f32.xlu0 %v248_v48  ;;  %v254_v57 = vsel %vm247_vm2, %v245_v54, -inf  ;;  %v257_v59 = vsel %vm247_vm2, %v246_v58, -inf }
 0x1ef   :  { %252 = vmax.xlane.f32.xlu0 %v251_v53 }
 0x1f3   :  { %255 = vmax.xlane.f32.xlu0 %v254_v57 }
 0x1f7   :  { %258 = vmax.xlane.f32.xlu0 %v257_v59 }
 0x274   :  { %v250_v60 = vpop.xlane.xlu0 %249 }
 0x275   :  { %v260_v61 = vsub.f32 %v243_v47, %v250_v60 }
 0x277   :  { %v264_v62 = vmul.f32 1.442695, %v260_v61 }
 0x278   :  { %v253_v63 = vpop.xlane.xlu0 %252 }
 0x279   :  { %1271 = vpow2.f32 %v264_v62  ;;  %v261_v0 = vsub.f32 %v244_v49, %v253_v63 }
 0x27b   :  { %v266_v1 = vmul.f32 1.442695, %v261_v0 }
 0x27c   :  { %v256_v2 = vpop.xlane.xlu0 %255 }
 0x27d   :  { %1273 = vpow2.f32 %v266_v1  ;;  %v262_v3 = vsub.f32 %v245_v54, %v256_v2 }
 0x27f   :  { %v268_v4 = vmul.f32 1.442695, %v262_v3 }
 0x280   :  { %v259_v5 = vpop.xlane.xlu0 %258 }
 0x281   :  { %1275 = vpow2.f32 %v268_v4  ;;  %v263_v6 = vsub.f32 %v246_v58, %v259_v5 }
 0x283   :  { %v270_v7 = vmul.f32 1.442695, %v263_v6 }
 0x285   :  { %1277 = vpow2.f32 %v270_v7 }
 0x286   :  { %v1272_v8 = vpop.eup %1271 }
 0x287   :  { %v272_v9 = vsel %vm247_vm2, %v1272_v8, 0.0 }
 0x288   :  { %273 = vadd.xlane.f32.xlu0 %v272_v9 }
 0x28a   :  { %v1274_v10 = vpop.eup %1273 }
 0x28b   :  { %v275_v11 = vsel %vm247_vm2, %v1274_v10, 0.0 }
 0x28c   :  { %276 = vadd.xlane.f32.xlu0 %v275_v11 }
 0x28e   :  { %v1276_v12 = vpop.eup %1275 }
 0x28f   :  { %v278_v13 = vsel %vm247_vm2, %v1276_v12, 0.0 }
 0x290   :  { %279 = vadd.xlane.f32.xlu1 %v278_v13 }
 0x292   :  { %v1278_v14 = vpop.eup %1277 }
 0x293   :  { %v281_v15 = vsel %vm247_vm2, %v1278_v14, 0.0 }
 0x294   :  { %282 = vadd.xlane.f32.xlu0 %v281_v15 }
 0x311   :  { %v274_v16 = vpop.xlane.xlu0 %273 }
 0x312   :  { %v284_v17 = vmax.f32 %v274_v16, 1e-30 }
 0x314   :  { %1279 = vrcp.f32 %v284_v17 }
 0x315   :  { %v277_v18 = vpop.xlane.xlu0 %276 }
 0x316   :  { %v285_v19 = vmax.f32 %v277_v18, 1e-30 }
 0x318   :  { %1281 = vrcp.f32 %v285_v19 }
 0x319   :  { %v280_v20 = vpop.xlane.xlu1 %279 }
 0x31a   :  { %v286_v21 = vmax.f32 %v280_v20, 1e-30 }
 0x31c   :  { %1283 = vrcp.f32 %v286_v21 }
 0x31d   :  { %v283_v22 = vpop.xlane.xlu0 %282 }
 0x31e   :  { %v287_v23 = vmax.f32 %v283_v22, 1e-30 }
 0x320   :  { %1285 = vrcp.f32 %v287_v23 }
 0x321   :  { %v1280_v24 = vpop.eup %1279 }
 0x322   :  { %v292_v26 = vmul.f32 %v1280_v24, %v1272_v8 }
 0x325   :  { %v1282_v25 = vpop.eup %1281 }
 0x326   :  { %v293_v27 = vmul.f32 %v1282_v25, %v1274_v10 }
 0x328   :  { %v296_v28 = vpack.c.bf16 %v293_v27, %v292_v26 }
 0x329   :  { %v1284_v30 = vpop.eup %1283 }
 0x32a   :  { %1175 = vmatprep.mubr.msk.bf16.mxu1 %vm247_vm2, %v296_v28  ;;  %v294_v32 = vmul.f32 %v1284_v30, %v1276_v12 }
 0x32d   :  { %v1286_v31 = vpop.eup %1285 }
 0x32e   :  { %v295_v33 = vmul.f32 %v1286_v31, %v1278_v14 }
 0x330   :  { %v297_v34 = vpack.c.bf16 %v295_v33, %v294_v32 }
 0x332   :  { %1176 = vmatmul.mubr.msk.bf16.vlgmr.msra.gmra.mxu1 %vm247_vm2, %v297_v34 }
 0x333   :  { %1180 = vmatpush3.bf16.msra.mxu1 %v1255_v35 }
 0x334   :  { %1181 = vmatprep.subr.bf16.mxu1 %v1256_v36 }
 0x337   :  { %1182 = vmatpush3.bf16.msra.mxu1 %v1256_v36 }
 0x338   :  { %1183 = vmatprep.subr.bf16.mxu1 %v1257_v38 }
 0x33b   :  { %1184 = vmatpush3.bf16.msra.mxu1 %v1257_v38 }
 0x33c   :  { %1185 = vmatprep.subr.bf16.mxu1 %v1258_v39 }
 0x33f   :  { %1186 = vmatpush3.bf16.msra.mxu1 %v1258_v39 }
 0x340   :  { %1187 = vmatprep.subr.bf16.mxu1 %v1259_v40 }
 0x343   :  { %1188 = vmatpush3.bf16.msra.mxu1 %v1259_v40 }
 0x344   :  { %1189 = vmatprep.subr.bf16.mxu1 %v1260_v42 }
 0x347   :  { %1190 = vmatpush3.bf16.msra.mxu1 %v1260_v42 }
 0x348   :  { %1191 = vmatprep.subr.bf16.mxu1 %v1261_v43 }
 0x34b   :  { %1192 = vmatpush3.bf16.msra.mxu1 %v1261_v43 }
 0x34c   :  { %1193 = vmatprep.subr.bf16.mxu1 %v1262_v44 }
 0x34f   :  { %1194 = vmatpush3.bf16.msra.mxu1 %v1262_v44 }
 0x3f2   :  { %v1177_v46 = vpop.f32.mrf.mxu1 }
 0x3f3   :  { %v356_v47 = vadd.f32 %v1177_v46, %v1065_v45 }
 0x3f4   :  { %v347_v48 = vpop.f32.mrf.mxu1 }
 0x3f5   :  { %v368_v49 = vmin.f32 %v356_v47, 0.0  ;;  %v348_v51 = vadd.f32 %v1065_v45, %v347_v48  ;;  %vm364_vm8 = vcmp.gt.f32.partialorder %v356_v47, 0.0 }
 0x3f6   :  { %v1178_v52 = vpop.f32.mrf.mxu1 }
 0x3f7   :  { %v374_v53 = vmul.f32 1.442695, %v368_v49  ;;  %v366_v54 = vmin.f32 %v348_v51, 0.0  ;;  %v359_v56 = vadd.f32 %v1178_v52, %v1065_v45  ;;  %vm362_vm6 = vcmp.gt.f32.partialorder %v348_v51, 0.0 }
 0x3f8   :  { %v350_v57 = vpop.f32.mrf.mxu1 }
 0x3f9   :  { %v370_v58 = vmul.f32 1.442695, %v366_v54  ;;  %v369_v59 = vmin.f32 %v359_v56, 0.0  ;;  %v351_v60 = vadd.f32 %v1065_v45, %v350_v57  ;;  %1287 = vpow2.f32 %v374_v53 }
 0x3fa   :  { %vm365_vm5 = vcmp.gt.f32.partialorder %v359_v56, 0.0 }
 0x3fb   :  { %v376_v61 = vmul.f32 1.442695, %v369_v59  ;;  %1289 = vpow2.f32 %v370_v58  ;;  %v367_v62 = vmin.f32 %v351_v60, 0.0  ;;  %vm363_vm7 = vcmp.gt.f32.partialorder %v351_v60, 0.0 }
 0x3fd   :  { %1291 = vpow2.f32 %v376_v61  ;;  %v372_v63 = vmul.f32 1.442695, %v367_v62 }
 0x3ff   :  { %1293 = vpow2.f32 %v372_v63 }
 0x406   :  { %v1288_v0 = vpop.eup %1287 }
 0x407   :  { %v1070_v6 = vadd.f32 -1.0, %v1288_v0 }
 0x408   :  { %v1290_v1 = vpop.eup %1289 }
 0x409   :  { %v1068_v4 = vadd.f32 -1.0, %v1290_v1  ;;  %v384_v11 = vsel %vm364_vm8, %v356_v47, %v1070_v6 }
 0x40a   :  { %v1292_v2 = vpop.eup %1291 }
 0x40b   :  { %v1071_v3 = vadd.f32 -1.0, %v1292_v2  ;;  %v382_v9 = vsel %vm362_vm6, %v348_v51, %v1068_v4 }
 0x40c   :  { %v1294_v5 = vpop.eup %1293 }
 0x40d   :  { %v1069_v7 = vadd.f32 -1.0, %v1294_v5  ;;  %v385_v8 = vsel %vm365_vm5, %v359_v56, %v1071_v3 }
 0x40e   :  { %v387_v13 = vpack.c.bf16 %v385_v8, %v384_v11 }
 0x40f   :  { %v383_v10 = vsel %vm363_vm7, %v351_v60, %v1069_v7 }
 0x410   :  { %v386_v12 = vpack.c.bf16 %v383_v10, %v382_v9 }
 0x412   :  { %1195 = vmatprep.mubr.bf16.mxu1 %v386_v12 }
 0x413   :  { %1196 = vmatmul.mubr.bf16.vlgmr.msra.gmra.mxu1 %v387_v13 }
 0x4d3   :  { %v1197_v14 = vpop.f32.mrf.mxu1 }
 0x4d4   :  { %510 = vrot.lane.b32.xlu0 %v1197_v14, %s1361_s29 }
 0x4d5   :  { %v487_v15 = vpop.f32.mrf.mxu1 }
 0x4d6   :  { %551 = vperm.xlu1 %1244, %v487_v15  }
 0x4d7   :  { %v1198_v16 = vpop.f32.mrf.mxu1 }
 0x4d8   :  { %v641_v17 = vpack.c.bf16 %v1198_v16, %v1197_v14  ;;  %506 = vrot.lane.b32.xlu0 %v487_v15, %s1361_s29 }
 0x4d9   :  { %v490_v18 = vpop.f32.mrf.mxu1 }
 0x4da   :  { %v640_v19 = vpack.c.bf16 %v490_v18, %v487_v15  ;;  %1199 = vmatprep.subr.bf16.mxu1 %v641_v17 }
 0x4db   :  { %1200 = vmatpush3.bf16.msra.mxu1 %v641_v17 }
 0x4dc   :  { %508 = vrot.lane.b32.xlu0 %v490_v18, %s1361_s29  ;;  %1201 = vmatprep.subr.bf16.mxu1 %v640_v19 }
 0x4df   :  { %1202 = vmatpush3.bf16.msra.mxu1 %v640_v19 }
 0x4e0   :  { %512 = vrot.lane.b32.xlu0 %v1198_v16, %s1361_s29 }
 0x4e4   :  { %559 = vperm.xlu0 %1243, %v1197_v14  }
 0x4e8   :  { %563 = vperm.xlu0 %1243, %v1198_v16  }
 0x4ec   :  { %555 = vperm.xlu0 %1243, %v490_v18  }
 0x546   :  { %v511_v20 = vpop.permute.xlu0 %510 }
 0x54a   :  { %v507_v21 = vpop.permute.xlu0 %506 }
 0x54b   :  { %518 = vxpose.xlu0.b32.start [1/4] (short) (narrow) %v507_v21, 8 }
 0x54e   :  { %v509_v22 = vpop.permute.xlu0 %508 }
 0x54f   :  { %519 = vxpose.xlu0.b32.cont [2/4] (short) (narrow) %v509_v22, 8 }
 0x551   :  { %v552_v30 = vpop.permute.xlu1 %551 }
 0x552   :  { %v513_v23 = vpop.permute.xlu0 %512 }
 0x553   :  { %520 = vxpose.xlu0.b32.cont [3/4] (short) (narrow) %v511_v20, 8 }
 0x557   :  { %521 = vxpose.xlu0.b32.end [4/4] (short) (narrow) %v513_v23, 8 }
 0x55f   :  { %v560_v24 = vpop.permute.xlu0 %559 }
 0x563   :  { %v564_v25 = vpop.permute.xlu0 %563 }
 0x567   :  { %v556_v26 = vpop.permute.xlu0 %555 }
 0x5c7   :  { %v534_v27 = vpop.trf.xlu0 }
 0x5c8   :  { %v569_v28 = vrot.slane %v534_v27, %v1408_v29 }
 0x5ca   :  { %v572_v31 = vadd.f32 %v569_v28, %v560_v24  ;;  %v570_v32 = vadd.f32 %v569_v28, %v552_v30  ;;  %v571_v33 = vadd.f32 %v569_v28, %v556_v26  ;;  %v573_v34 = vadd.f32 %v569_v28, %v564_v25  ;;  %v1263_v30 = vld [vmem:[#allocation2 + $0xb8] sm:$0xff]  }
 0x5cb   :  { %1207 = vmatprep.subr.bf16.mxu0 %v1263_v30 }
 0x5cc   :  { %vm576_vm9 = vcmp.gt.f32.partialorder %v572_v31, 0.0  ;;  %v580_v35 = vmul.f32 0.2, %v572_v31  ;;  %vm574_vm10 = vcmp.gt.f32.partialorder %v570_v32, 0.0  ;;  %v578_v36 = vmul.f32 0.2, %v570_v32  ;;  %1208 = vmatpush3.bf16.msra.mxu0 %v1263_v30 }
 0x5cd   :  { %vm575_vm11 = vcmp.gt.f32.partialorder %v571_v33, 0.0  ;;  %v579_v38 = vmul.f32 0.2, %v571_v33  ;;  %v581_v42 = vmul.f32 0.2, %v573_v34  ;;  %vm577_vm12 = vcmp.gt.f32.partialorder %v573_v34, 0.0 }
 0x5ce   :  { %v584_v39 = vsel %vm576_vm9, %v572_v31, %v580_v35  ;;  %v582_v40 = vsel %vm574_vm10, %v570_v32, %v578_v36  ;;  %v1264_v31 = vld [vmem:[#allocation2 + $0xb0] sm:$0xff]   ;;  %v1265_v32 = vld [vmem:[#allocation2 + $0xa8] sm:$0xff]  }
 0x5cf   :  { %v588_v43 = vadd.f32 %v1424_v50, %v584_v39  ;;  %v586_v44 = vadd.f32 %v1414_v37, %v582_v40  ;;  %v583_v45 = vsel %vm575_vm11, %v571_v33, %v579_v38  ;;  %v585_v49 = vsel %vm577_vm12, %v573_v34, %v581_v42  ;;  %1209 = vmatprep.subr.bf16.mxu0 %v1264_v31  ;;  %v1266_v33 = vld [vmem:[#allocation2 + $0xa0] sm:$0xff]   ;;  %v1267_v34 = vld [vmem:[#allocation2 + $0x98] sm:$0xff]   ;;  %v1268_v35 = vld [vmem:[#allocation2 + $0x90] sm:$0xff]  }
 0x5d0   :  { %v587_v48 = vadd.f32 %v1416_v41, %v583_v45  ;;  %v589_v52 = vadd.f32 %v1428_v55, %v585_v49  ;;  %1210 = vmatpush3.bf16.msra.mxu0 %v1264_v31  ;;  %v1269_v36 = vld [vmem:[#allocation2 + $0x88] sm:$0xff]   ;;  %v1270_v38 = vld [vmem:[#allocation2 + $0x80] sm:$0xff]  }
 0x5d1   :  { %v596_v46 = vsel %vm247_vm2, %v588_v43, -inf  ;;  %v590_v47 = vsel %vm247_vm2, %v586_v44, -inf  ;;  %1211 = vmatprep.subr.bf16.mxu0 %v1265_v32  ;;  %v1081_v39 = vld [vmem:[%s1497_s3 + $0x1] ss:$0 sm:$0xff] }
 0x5d2   :  { %597 = vmax.xlane.f32.xlu0 %v596_v46  ;;  %591 = vmax.xlane.f32.xlu1 %v590_v47  ;;  %v593_v51 = vsel %vm247_vm2, %v587_v48, -inf  ;;  %v599_v53 = vsel %vm247_vm2, %v589_v52, -inf }
 0x5d4   :  { %1212 = vmatpush3.bf16.msra.mxu0 %v1265_v32 }
 0x5d5   :  { %1213 = vmatprep.subr.bf16.mxu0 %v1266_v33 }
 0x5d6   :  { %594 = vmax.xlane.f32.xlu1 %v593_v51 }
 0x5d8   :  { %1214 = vmatpush3.bf16.msra.mxu0 %v1266_v33 }
 0x5d9   :  { %1215 = vmatprep.subr.bf16.mxu0 %v1267_v34 }
 0x5da   :  { %600 = vmax.xlane.f32.xlu1 %v599_v53 }
 0x5dc   :  { %1216 = vmatpush3.bf16.msra.mxu0 %v1267_v34 }
 0x5dd   :  { %1217 = vmatprep.subr.bf16.mxu0 %v1268_v35 }
 0x5e0   :  { %1218 = vmatpush3.bf16.msra.mxu0 %v1268_v35 }
 0x5e1   :  { %1219 = vmatprep.subr.bf16.mxu0 %v1269_v36 }
 0x5e4   :  { %1220 = vmatpush3.bf16.msra.mxu0 %v1269_v36 }
 0x5e5   :  { %1221 = vmatprep.subr.bf16.mxu0 %v1270_v38 }
 0x5e8   :  { %1222 = vmatpush3.bf16.msra.mxu0 %v1270_v38 }
 0x65b   :  { %v592_v54 = vpop.xlane.xlu1 %591  ;;  %v598_v56 = vpop.xlane.xlu0 %597 }
 0x65c   :  { %v602_v57 = vsub.f32 %v586_v44, %v592_v54  ;;  %v604_v59 = vsub.f32 %v588_v43, %v598_v56 }
 0x65e   :  { %v606_v58 = vmul.f32 1.442695, %v602_v57  ;;  %v610_v63 = vmul.f32 1.442695, %v604_v59 }
 0x65f   :  { %v595_v60 = vpop.xlane.xlu1 %594 }
 0x660   :  { %v603_v61 = vsub.f32 %v587_v48, %v595_v60  ;;  %1295 = vpow2.f32 %v606_v58 }
 0x662   :  { %v608_v62 = vmul.f32 1.442695, %v603_v61 }
 0x663   :  { %v601_v0 = vpop.xlane.xlu1 %600 }
 0x664   :  { %1297 = vpow2.f32 %v608_v62  ;;  %v605_v1 = vsub.f32 %v589_v52, %v601_v0 }
 0x665   :  { %1299 = vpow2.f32 %v610_v63 }
 0x666   :  { %v612_v2 = vmul.f32 1.442695, %v605_v1 }
 0x668   :  { %1301 = vpow2.f32 %v612_v2 }
 0x66d   :  { %v1296_v3 = vpop.eup %1295 }
 0x66e   :  { %v614_v4 = vsel %vm247_vm2, %v1296_v3, 0.0 }
 0x66f   :  { %615 = vadd.xlane.f32.xlu1 %v614_v4 }
 0x671   :  { %v1298_v5 = vpop.eup %1297 }
 0x672   :  { %v617_v6 = vsel %vm247_vm2, %v1298_v5, 0.0  ;;  %v1300_v7 = vpop.eup %1299 }
 0x673   :  { %618 = vadd.xlane.f32.xlu1 %v617_v6  ;;  %v620_v8 = vsel %vm247_vm2, %v1300_v7, 0.0 }
 0x675   :  { %v1302_v9 = vpop.eup %1301 }
 0x676   :  { %v623_v10 = vsel %vm247_vm2, %v1302_v9, 0.0 }
 0x677   :  { %621 = vadd.xlane.f32.xlu1 %v620_v8 }
 0x67b   :  { %624 = vadd.xlane.f32.xlu1 %v623_v10 }
 0x6f8   :  { %v616_v11 = vpop.xlane.xlu1 %615 }
 0x6f9   :  { %v626_v12 = vmax.f32 %v616_v11, 1e-30 }
 0x6fb   :  { %1303 = vrcp.f32 %v626_v12 }
 0x6fc   :  { %v619_v13 = vpop.xlane.xlu1 %618 }
 0x6fd   :  { %v627_v14 = vmax.f32 %v619_v13, 1e-30 }
 0x6ff   :  { %1305 = vrcp.f32 %v627_v14 }
 0x700   :  { %v622_v15 = vpop.xlane.xlu1 %621 }
 0x701   :  { %v628_v16 = vmax.f32 %v622_v15, 1e-30 }
 0x703   :  { %1307 = vrcp.f32 %v628_v16 }
 0x704   :  { %v625_v17 = vpop.xlane.xlu1 %624 }
 0x705   :  { %v629_v18 = vmax.f32 %v625_v17, 1e-30 }
 0x707   :  { %1309 = vrcp.f32 %v629_v18 }
 0x708   :  { %v1304_v19 = vpop.eup %1303 }
 0x709   :  { %v634_v21 = vmul.f32 %v1304_v19, %v1296_v3 }
 0x70c   :  { %v1306_v20 = vpop.eup %1305 }
 0x70d   :  { %v635_v22 = vmul.f32 %v1306_v20, %v1298_v5 }
 0x70f   :  { %v638_v23 = vpack.c.bf16 %v635_v22, %v634_v21 }
 0x710   :  { %v1308_v24 = vpop.eup %1307 }
 0x711   :  { %1203 = vmatprep.mubr.msk.bf16.mxu1 %vm247_vm2, %v638_v23  ;;  %v636_v26 = vmul.f32 %v1308_v24, %v1300_v7 }
 0x714   :  { %v1310_v25 = vpop.eup %1309 }
 0x715   :  { %v637_v27 = vmul.f32 %v1310_v25, %v1302_v9  ;;  %v1362_v9 = vmov 9  }
 0x716   :  { %1245 = vset.pattern.permute.xlu1 %v1362_v9  ;;  %1246 = vset.pattern.permute.xlu0 %v1362_v9 }
 0x717   :  { %v639_v28 = vpack.c.bf16 %v637_v27, %v636_v26 }
 0x719   :  { %1204 = vmatmul.mubr.msk.bf16.vlgmr.msra.gmra.mxu1 %vm247_vm2, %v639_v28 }
 0x7d9   :  { %v1205_v40 = vpop.f32.mrf.mxu1 }
 0x7da   :  { %v699_v42 = vadd.f32 %v1205_v40, %v1081_v39 }
 0x7db   :  { %v690_v43 = vpop.f32.mrf.mxu1 }
 0x7dc   :  { %v711_v44 = vmin.f32 %v699_v42, 0.0  ;;  %v691_v45 = vadd.f32 %v1081_v39, %v690_v43  ;;  %vm707_vm0 = vcmp.gt.f32.partialorder %v699_v42, 0.0 }
 0x7dd   :  { %v1206_v46 = vpop.f32.mrf.mxu1 }
 0x7de   :  { %v717_v47 = vmul.f32 1.442695, %v711_v44  ;;  %v709_v48 = vmin.f32 %v691_v45, 0.0  ;;  %v702_v49 = vadd.f32 %v1206_v46, %v1081_v39  ;;  %vm705_vm14 = vcmp.gt.f32.partialorder %v691_v45, 0.0 }
 0x7df   :  { %v693_v51 = vpop.f32.mrf.mxu1 }
 0x7e0   :  { %v713_v52 = vmul.f32 1.442695, %v709_v48  ;;  %v712_v53 = vmin.f32 %v702_v49, 0.0  ;;  %v694_v54 = vadd.f32 %v1081_v39, %v693_v51  ;;  %1311 = vpow2.f32 %v717_v47 }
 0x7e1   :  { %vm708_vm13 = vcmp.gt.f32.partialorder %v702_v49, 0.0 }
 0x7e2   :  { %v719_v56 = vmul.f32 1.442695, %v712_v53  ;;  %1313 = vpow2.f32 %v713_v52  ;;  %v710_v57 = vmin.f32 %v694_v54, 0.0  ;;  %vm706_vm15 = vcmp.gt.f32.partialorder %v694_v54, 0.0 }
 0x7e4   :  { %1315 = vpow2.f32 %v719_v56  ;;  %v715_v58 = vmul.f32 1.442695, %v710_v57 }
 0x7e6   :  { %1317 = vpow2.f32 %v715_v58 }
 0x7ed   :  { %v1312_v59 = vpop.eup %1311 }
 0x7ee   :  { %v1086_v1 = vadd.f32 -1.0, %v1312_v59 }
 0x7ef   :  { %v1314_v60 = vpop.eup %1313 }
 0x7f0   :  { %v1084_v63 = vadd.f32 -1.0, %v1314_v60  ;;  %v727_v6 = vsel %vm707_vm0, %v699_v42, %v1086_v1 }
 0x7f1   :  { %v1316_v61 = vpop.eup %1315 }
 0x7f2   :  { %v1087_v62 = vadd.f32 -1.0, %v1316_v61  ;;  %v725_v4 = vsel %vm705_vm14, %v691_v45, %v1084_v63 }
 0x7f3   :  { %v1318_v0 = vpop.eup %1317 }
 0x7f4   :  { %v1085_v2 = vadd.f32 -1.0, %v1318_v0  ;;  %v728_v3 = vsel %vm708_vm13, %v702_v49, %v1087_v62 }
 0x7f5   :  { %v730_v8 = vpack.c.bf16 %v728_v3, %v727_v6 }
 0x7f6   :  { %v726_v5 = vsel %vm706_vm15, %v694_v54, %v1085_v2 }
 0x7f7   :  { %v729_v7 = vpack.c.bf16 %v726_v5, %v725_v4 }
 0x7f9   :  { %1223 = vmatprep.mubr.bf16.mxu0 %v729_v7 }
 0x7fa   :  { %1224 = vmatmul.mubr.bf16.vlgmr.msra.gmra.mxu0 %v730_v8 }
 0x8ba   :  { %v1225_v10 = vpop.f32.mrf.mxu0 }
 0x8bb   :  { %853 = vrot.lane.b32.xlu1 %v1225_v10, %s1363_s10 }
 0x8bc   :  { %v830_v11 = vpop.f32.mrf.mxu0 }
 0x8be   :  { %v1226_v12 = vpop.f32.mrf.mxu0 }
 0x8bf   :  { %v984_v13 = vpack.c.bf16 %v1226_v12, %v1225_v10  ;;  %849 = vrot.lane.b32.xlu1 %v830_v11, %s1363_s10  ;;  %855 = vrot.lane.b32.xlu0 %v1226_v12, %s1363_s10 }
 0x8c0   :  { %v833_v14 = vpop.f32.mrf.mxu0 }
 0x8c1   :  { %v983_v15 = vpack.c.bf16 %v833_v14, %v830_v11  ;;  %1227 = vmatprep.subr.bf16.mxu1 %v984_v13 }
 0x8c2   :  { %1228 = vmatpush3.bf16.msra.mxu1 %v984_v13 }
 0x8c3   :  { %894 = vperm.xlu1 %1245, %v830_v11   ;;  %1229 = vmatprep.subr.bf16.mxu1 %v983_v15 }
 0x8c6   :  { %1230 = vmatpush3.bf16.msra.mxu1 %v983_v15 }
 0x8c7   :  { %851 = vrot.lane.b32.xlu1 %v833_v14, %s1363_s10 }
 0x8cb   :  { %902 = vperm.xlu1 %1245, %v1225_v10  }
 0x8cf   :  { %906 = vperm.xlu1 %1245, %v1226_v12  }
 0x8d3   :  { %898 = vperm.xlu1 %1245, %v833_v14  }
 0x92d   :  { %v854_v16 = vpop.permute.xlu1 %853 }
 0x931   :  { %v850_v17 = vpop.permute.xlu1 %849  ;;  %v856_v20 = vpop.permute.xlu0 %855 }
 0x932   :  { %861 = vxpose.xlu1.b32.start [1/4] (short) (narrow) %v850_v17, 8 }
 0x93e   :  { %v895_v18 = vpop.permute.xlu1 %894 }
 0x942   :  { %v852_v19 = vpop.permute.xlu1 %851 }
 0x943   :  { %862 = vxpose.xlu1.b32.cont [2/4] (short) (narrow) %v852_v19, 8 }
 0x946   :  { %v903_v21 = vpop.permute.xlu1 %902 }
 0x947   :  { %863 = vxpose.xlu1.b32.cont [3/4] (short) (narrow) %v854_v16, 8 }
 0x94a   :  { %v907_v22 = vpop.permute.xlu1 %906 }
 0x94b   :  { %864 = vxpose.xlu1.b32.end [4/4] (short) (narrow) %v856_v20, 8  ;;  %v1097_v20 = vld [vmem:[%s1497_s3 + $0x2] ss:$0 sm:$0xff] }
 0x94e   :  { %v899_v23 = vpop.permute.xlu1 %898 }
 0x9bb   :  { %v877_v24 = vpop.trf.xlu1 }
 0x9bc   :  { %v912_v25 = vrot.slane %v877_v24, %v1408_v29 }
 0x9be   :  { %v913_v26 = vadd.f32 %v912_v25, %v895_v18  ;;  %v914_v27 = vadd.f32 %v912_v25, %v899_v23  ;;  %v915_v28 = vadd.f32 %v912_v25, %v903_v21  ;;  %v916_v35 = vadd.f32 %v912_v25, %v907_v22 }
 0x9c0   :  { %vm917_vm1 = vcmp.gt.f32.partialorder %v913_v26, 0.0  ;;  %v921_v30 = vmul.f32 0.2, %v913_v26  ;;  %vm918_vm3 = vcmp.gt.f32.partialorder %v914_v27, 0.0  ;;  %v922_v31 = vmul.f32 0.2, %v914_v27 }
 0x9c1   :  { %v923_v34 = vmul.f32 0.2, %v915_v28  ;;  %vm919_vm4 = vcmp.gt.f32.partialorder %v915_v28, 0.0  ;;  %v924_v40 = vmul.f32 0.2, %v916_v35  ;;  %vm920_vm5 = vcmp.gt.f32.partialorder %v916_v35, 0.0 }
 0x9c2   :  { %v925_v32 = vsel %vm917_vm1, %v913_v26, %v921_v30  ;;  %v926_v33 = vsel %vm918_vm3, %v914_v27, %v922_v31 }
 0x9c3   :  { %v929_v36 = vadd.f32 %v1414_v37, %v925_v32  ;;  %v930_v39 = vadd.f32 %v1416_v41, %v926_v33  ;;  %v927_v29 = vsel %vm919_vm4, %v915_v28, %v923_v34  ;;  %v928_v44 = vsel %vm920_vm5, %v916_v35, %v924_v40 }
 0x9c4   :  { %v931_v43 = vadd.f32 %v1424_v50, %v927_v29  ;;  %v932_v46 = vadd.f32 %v1428_v55, %v928_v44 }
 0x9c5   :  { %v933_v38 = vsel %vm247_vm2, %v929_v36, -inf  ;;  %v936_v42 = vsel %vm247_vm2, %v930_v39, -inf }
 0x9c6   :  { %934 = vmax.xlane.f32.xlu0 %v933_v38  ;;  %v939_v45 = vsel %vm247_vm2, %v931_v43, -inf  ;;  %v942_v37 = vsel %vm247_vm2, %v932_v46, -inf }
 0x9ca   :  { %937 = vmax.xlane.f32.xlu0 %v936_v42 }
 0x9ce   :  { %940 = vmax.xlane.f32.xlu0 %v939_v45 }
 0x9d2   :  { %943 = vmax.xlane.f32.xlu0 %v942_v37 }
 0xa4f   :  { %v935_v47 = vpop.xlane.xlu0 %934 }
 0xa50   :  { %v945_v41 = vsub.f32 %v929_v36, %v935_v47 }
 0xa52   :  { %v949_v48 = vmul.f32 1.442695, %v945_v41 }
 0xa53   :  { %v938_v49 = vpop.xlane.xlu0 %937 }
 0xa54   :  { %1319 = vpow2.f32 %v949_v48  ;;  %v946_v51 = vsub.f32 %v930_v39, %v938_v49 }
 0xa56   :  { %v951_v52 = vmul.f32 1.442695, %v946_v51 }
 0xa57   :  { %v941_v53 = vpop.xlane.xlu0 %940 }
 0xa58   :  { %1321 = vpow2.f32 %v951_v52  ;;  %v947_v50 = vsub.f32 %v931_v43, %v941_v53 }
 0xa5a   :  { %v953_v54 = vmul.f32 1.442695, %v947_v50 }
 0xa5b   :  { %v944_v56 = vpop.xlane.xlu0 %943 }
 0xa5c   :  { %1323 = vpow2.f32 %v953_v54  ;;  %v948_v57 = vsub.f32 %v932_v46, %v944_v56 }
 0xa5e   :  { %v955_v58 = vmul.f32 1.442695, %v948_v57 }
 0xa60   :  { %1325 = vpow2.f32 %v955_v58 }
 0xa61   :  { %v1320_v55 = vpop.eup %1319 }
 0xa62   :  { %v957_v59 = vsel %vm247_vm2, %v1320_v55, 0.0 }
 0xa63   :  { %958 = vadd.xlane.f32.xlu0 %v957_v59 }
 0xa65   :  { %v1322_v60 = vpop.eup %1321 }
 0xa66   :  { %v960_v61 = vsel %vm247_vm2, %v1322_v60, 0.0 }
 0xa67   :  { %961 = vadd.xlane.f32.xlu0 %v960_v61 }
 0xa69   :  { %v1324_v62 = vpop.eup %1323 }
 0xa6a   :  { %v963_v63 = vsel %vm247_vm2, %v1324_v62, 0.0 }
 0xa6b   :  { %964 = vadd.xlane.f32.xlu1 %v963_v63 }
 0xa6d   :  { %v1326_v0 = vpop.eup %1325 }
 0xa6e   :  { %v966_v1 = vsel %vm247_vm2, %v1326_v0, 0.0 }
 0xa6f   :  { %967 = vadd.xlane.f32.xlu0 %v966_v1 }
 0xaec   :  { %v959_v2 = vpop.xlane.xlu0 %958 }
 0xaed   :  { %v969_v3 = vmax.f32 %v959_v2, 1e-30 }
 0xaef   :  { %1327 = vrcp.f32 %v969_v3 }
 0xaf0   :  { %v962_v4 = vpop.xlane.xlu0 %961 }
 0xaf1   :  { %v970_v5 = vmax.f32 %v962_v4, 1e-30 }
 0xaf3   :  { %1329 = vrcp.f32 %v970_v5 }
 0xaf4   :  { %v965_v6 = vpop.xlane.xlu1 %964 }
 0xaf5   :  { %v971_v7 = vmax.f32 %v965_v6, 1e-30 }
 0xaf7   :  { %1331 = vrcp.f32 %v971_v7 }
 0xaf8   :  { %v968_v8 = vpop.xlane.xlu0 %967 }
 0xaf9   :  { %v972_v9 = vmax.f32 %v968_v8, 1e-30 }
 0xafb   :  { %1333 = vrcp.f32 %v972_v9 }
 0xafc   :  { %v1328_v10 = vpop.eup %1327 }
 0xafd   :  { %v977_v12 = vmul.f32 %v1328_v10, %v1320_v55 }
 0xb00   :  { %v1330_v11 = vpop.eup %1329 }
 0xb01   :  { %v978_v13 = vmul.f32 %v1330_v11, %v1322_v60 }
 0xb03   :  { %v981_v14 = vpack.c.bf16 %v978_v13, %v977_v12 }
 0xb04   :  { %v1332_v15 = vpop.eup %1331 }
 0xb05   :  { %1231 = vmatprep.mubr.msk.bf16.mxu1 %vm247_vm2, %v981_v14  ;;  %v979_v17 = vmul.f32 %v1332_v15, %v1324_v62 }
 0xb08   :  { %v1334_v16 = vpop.eup %1333 }
 0xb09   :  { %v980_v18 = vmul.f32 %v1334_v16, %v1326_v0 }
 0xb0b   :  { %v982_v19 = vpack.c.bf16 %v980_v18, %v979_v17 }
 0xb0d   :  { %1232 = vmatmul.mubr.msk.bf16.vlgmr.msra.gmra.mxu1 %vm247_vm2, %v982_v19 }
 0xbcd   :  { %v1233_v21 = vpop.f32.mrf.mxu1 }
 0xbce   :  { %v1042_v22 = vadd.f32 %v1233_v21, %v1097_v20 }
 0xbcf   :  { %v1033_v23 = vpop.f32.mrf.mxu1 }
 0xbd0   :  { %1050 = vst [vmem:[%s1498_s4 + $0x10] sm:$0xff] %v1042_v22  ;;  %v1034_v24 = vadd.f32 %v1097_v20, %v1033_v23 }
 0xbd1   :  { %v1234_v25 = vpop.f32.mrf.mxu1 }
 0xbd2   :  { %1048 = vst [vmem:[%s1498_s4] sm:$0xff] %v1034_v24  ;;  %v1045_v26 = vadd.f32 %v1234_v25, %v1097_v20 }
 0xbd3   :  { %v1036_v27 = vpop.f32.mrf.mxu1 }
 0xbd4   :  { %1051 = vst [vmem:[%s1498_s4 + $0x18] sm:$0xff] %v1045_v26  ;;  %v1037_v28 = vadd.f32 %v1097_v20, %v1036_v27 }
 0xbd6   :  { %1049 = vst [vmem:[%s1498_s4 + $0x8] sm:$0xff] %v1037_v28 }
 0xbd7   :  { %1056 = vsyncpa [#allocation3], 1 }

</bundles_post_ra>
